<compile_context>
chip_gen: v5e
topology: v5e:2x2
jax: 0.10.0
libtpu: 0.0.40
codegen_flags: <defaults>
</compile_context>

<pallas_src>
import functools
import numpy as np
import jax
import jax.numpy as jnp
from jax import lax
from jax.experimental import pallas as pl
from jax.experimental.pallas import tpu as pltpu


def _crop_cat_kernel(x_ref, w_ref, b_ref, o_ref, *, strip):
    """One (K, TH, WB) slab: pointwise channel mix K -> C_out, strip by strip.

    x_ref: (K, TH, WB)     VMEM -- fused input slab (one crop row, >=1 crops wide)
    w_ref: (C_out, K)      SMEM -- 1x1-conv weights (scalar table)
    b_ref: (C_out,)        SMEM -- bias
    o_ref: (C_out, TH, WB) VMEM -- matching slab of the assembled output grid
    """
    K, TH, WB = x_ref.shape
    C_out = o_ref.shape[0]

    # Hoist scalar parameter reads (SMEM) out of the strip loop.
    wv = [[w_ref[o, k] for k in range(K)] for o in range(C_out)]
    bv = [b_ref[o] for o in range(C_out)]

    n_strips = TH // strip

    def strip_body(s, carry):
        r0 = pl.multiple_of(s * strip, strip)
        # k-outer MAC: each input channel strip is loaded exactly once and all
        # C_out accumulators (strip x WB each, held in vregs) are updated.
        x0 = x_ref[0, pl.ds(r0, strip), :].astype(jnp.float32)
        accs = [x0 * wv[o][0] + bv[o] for o in range(C_out)]
        for k in range(1, K):
            xk = x_ref[k, pl.ds(r0, strip), :].astype(jnp.float32)
            accs = [accs[o] + wv[o][k] * xk for o in range(C_out)]
        for o in range(C_out):
            o_ref[o, pl.ds(r0, strip), :] = accs[o].astype(o_ref.dtype)
        return carry

    lax.fori_loop(0, n_strips, strip_body, 0)


def crop_cat_forward(x, w, b, crop_size=(256, 256), crop_border=False):
    """Pallas implementation of CropCatModule.forward (inner model = 1x1 conv).

    x: (B=1, F, C, H, W) float32
    w: (C_out, F*C) float32
    b: (C_out,) float32
    returns: (1, C_out, H, W) float32
    """
    B, F, C, H, W = x.shape
    assert B == 1
    x_size = np.array([H, W])
    cs = np.array(crop_size)
    if (x_size % cs).any():
        raise Exception(f'{x_size} % {cs} != 0')
    num_crops = x_size // cs
    assert not crop_border
    # TODO(synk): crop_border=True border-paint branch is dead code in the
    # reference module (guarded by `assert not self.crop_border`); not
    # implemented here.

    K = F * C
    C_out = w.shape[0]
    th, tw = int(cs[0]), int(cs[1])
    ncy, ncx = int(num_crops[0]), int(num_crops[1])
    x_khw = x.reshape(K, H, W)

    # --- Fuse crops along W into one wide block.  The 1x1-conv model is
    # pointwise, so fusing crops is exact.  Cap the block so the
    # double-buffered (input + output) working set stays under a conservative
    # VMEM budget that also fits v7x's 64 MiB VMEM.
    itemsize = x.dtype.itemsize
    vmem_budget = 20 * 1024 * 1024

    def fits(n_crops_wide):
        wb_ = n_crops_wide * tw
        return 2 * (K + C_out) * th * wb_ * itemsize <= vmem_budget

    n_fuse = 1
    for n in range(ncx, 0, -1):
        if ncx % n == 0 and fits(n):
            n_fuse = n
            break
    # Keep >=2 grid steps so v7x's two TensorCores both get work.
    if ncy == 1 and n_fuse == ncx and ncx > 1:
        for n in range(ncx // 2, 0, -1):
            if ncx % n == 0:
                n_fuse = n
                break
    wb = n_fuse * tw
    grid = (ncy, ncx // n_fuse)

    # --- Row-strip size for the in-kernel loop: keep the (C_out accumulators
    # + 1 input strip) live set under ~48 vregs so nothing spills to VMEM.
    strip = 8
    for cand in (64, 32, 16, 8):
        if th % cand == 0 and (C_out + 1) * cand * wb <= 48 * 1024:
            strip = cand
            break
    assert th % strip == 0

    out = pl.pallas_call(
        functools.partial(_crop_cat_kernel, strip=strip),
        out_shape=jax.ShapeDtypeStruct((C_out, H, W), x.dtype),
        grid_spec=pltpu.PrefetchScalarGridSpec(
            num_scalar_prefetch=0,
            grid=grid,
            in_specs=[
                # one fused input slab per grid step (crop row i, fused cols j)
                pl.BlockSpec((K, th, wb), lambda i, j: (0, i, j)),
                # small parameter tables live in SMEM, whole-array
                pl.BlockSpec(memory_space=pltpu.MemorySpace.SMEM),
                pl.BlockSpec(memory_space=pltpu.MemorySpace.SMEM),
            ],
            # each grid step writes its slab into the assembled output grid
            out_specs=pl.BlockSpec((C_out, th, wb), lambda i, j: (0, i, j)),
        ),
        compiler_params=pltpu.CompilerParams(
            dimension_semantics=("parallel", "parallel"),
            vmem_limit_bytes=32 * 1024 * 1024,
        ),
    )(x_khw, w, b)
    return out[None]  # re-add batch dim -> (1, C_out, H, W)


def _reference_forward(x, w, b, crop_size=(256, 256)):
    """Pure-JAX reference mirroring the PyTorch crop -> model -> grid-cat."""
    B, F, C, H, W = x.shape
    assert B == 1
    cs = np.array(crop_size)
    num_crops = np.array([H, W]) // cs
    K = F * C
    C_out = w.shape[0]
    x_khw = x.reshape(K, H, W)

    def model(crop):  # crop: (K, th, tw) -> (C_out, th, tw)
        return jnp.einsum('ok,khw->ohw', w, crop) + b[:, None, None]

    out = jnp.zeros((C_out, H, W), dtype=x.dtype)
    for i in range(num_crops[0]):
        for j in range(num_crops[1]):
            y1, y2 = i * cs[0], (i + 1) * cs[0]
            x1, x2 = j * cs[1], (j + 1) * cs[1]
            out = out.at[:, y1:y2, x1:x2].set(
                model(x_khw[:, y1:y2, x1:x2]).astype(x.dtype))
    return out[None]


if __name__ == "__main__":
    # Small shapes consistent with the module: crop_size=(256,256) hard-coded
    # in __init__, H = W = 512 -> a 2x2 crop grid; F=2 frames, C=3 channels.
    B, F, C, H, W = 1, 2, 3, 512, 512
    C_out = 4
    K = F * C

    key = jax.random.PRNGKey(0)
    kx, kw, kb = jax.random.split(key, 3)
    x = jax.random.normal(kx, (B, F, C, H, W), dtype=jnp.float32)
    w = jax.random.normal(kw, (C_out, K), dtype=jnp.float32) * 0.1
    b = jax.random.normal(kb, (C_out,), dtype=jnp.float32) * 0.1

    out = crop_cat_forward(x, w, b, crop_size=(256, 256), crop_border=False)
    out = jax.block_until_ready(out)

    ref = _reference_forward(x, w, b, crop_size=(256, 256))
    assert out.shape == (B, C_out, H, W), out.shape
    np.testing.assert_allclose(np.asarray(out), np.asarray(ref),
                               rtol=1e-5, atol=1e-5)
    print("KERNEL_OK")
</pallas_src>

<mosaic_0001>
module attributes {stable_mosaic.version = 11 : i64} {
  func.func @_crop_cat_kernel(%arg0: i32, %arg1: i32, %arg2: memref<6x256x512xf32, #tpu.memory_space<vmem>>, %arg3: memref<4x6xf32, #tpu.memory_space<smem>>, %arg4: memref<4xf32, #tpu.memory_space<smem>>, %arg5: memref<4x256x512xf32, #tpu.memory_space<vmem>>) attributes {dimension_semantics = [#tpu.dimension_semantics<parallel>, #tpu.dimension_semantics<parallel>], iteration_bounds = array<i64: 2, 1>, scalar_prefetch = 0 : i64, scratch_operands = 0 : i64, tpu.core_type = #tpu.core_type<tc>, window_params = [{transform_indices = @transform_0, window_bounds = array<i64: 6, 256, 512>}, {transform_indices = @transform_1, window_bounds = array<i64: 4, 6>}, {transform_indices = @transform_2, window_bounds = array<i64: 4>}, {transform_indices = @transform_3, window_bounds = array<i64: 4, 256, 512>}]} {
    %c0 = arith.constant 0 : index
    %c0_0 = arith.constant 0 : index
    %0 = memref.load %arg3[%c0, %c0_0] : memref<4x6xf32, #tpu.memory_space<smem>>
    %c0_1 = arith.constant 0 : index
    %c1 = arith.constant 1 : index
    %1 = memref.load %arg3[%c0_1, %c1] : memref<4x6xf32, #tpu.memory_space<smem>>
    %c0_2 = arith.constant 0 : index
    %c2 = arith.constant 2 : index
    %2 = memref.load %arg3[%c0_2, %c2] : memref<4x6xf32, #tpu.memory_space<smem>>
    %c0_3 = arith.constant 0 : index
    %c3 = arith.constant 3 : index
    %3 = memref.load %arg3[%c0_3, %c3] : memref<4x6xf32, #tpu.memory_space<smem>>
    %c0_4 = arith.constant 0 : index
    %c4 = arith.constant 4 : index
    %4 = memref.load %arg3[%c0_4, %c4] : memref<4x6xf32, #tpu.memory_space<smem>>
    %c0_5 = arith.constant 0 : index
    %c5 = arith.constant 5 : index
    %5 = memref.load %arg3[%c0_5, %c5] : memref<4x6xf32, #tpu.memory_space<smem>>
    %c1_6 = arith.constant 1 : index
    %c0_7 = arith.constant 0 : index
    %6 = memref.load %arg3[%c1_6, %c0_7] : memref<4x6xf32, #tpu.memory_space<smem>>
    %c1_8 = arith.constant 1 : index
    %c1_9 = arith.constant 1 : index
    %7 = memref.load %arg3[%c1_8, %c1_9] : memref<4x6xf32, #tpu.memory_space<smem>>
    %c1_10 = arith.constant 1 : index
    %c2_11 = arith.constant 2 : index
    %8 = memref.load %arg3[%c1_10, %c2_11] : memref<4x6xf32, #tpu.memory_space<smem>>
    %c1_12 = arith.constant 1 : index
    %c3_13 = arith.constant 3 : index
    %9 = memref.load %arg3[%c1_12, %c3_13] : memref<4x6xf32, #tpu.memory_space<smem>>
    %c1_14 = arith.constant 1 : index
    %c4_15 = arith.constant 4 : index
    %10 = memref.load %arg3[%c1_14, %c4_15] : memref<4x6xf32, #tpu.memory_space<smem>>
    %c1_16 = arith.constant 1 : index
    %c5_17 = arith.constant 5 : index
    %11 = memref.load %arg3[%c1_16, %c5_17] : memref<4x6xf32, #tpu.memory_space<smem>>
    %c2_18 = arith.constant 2 : index
    %c0_19 = arith.constant 0 : index
    %12 = memref.load %arg3[%c2_18, %c0_19] : memref<4x6xf32, #tpu.memory_space<smem>>
    %c2_20 = arith.constant 2 : index
    %c1_21 = arith.constant 1 : index
    %13 = memref.load %arg3[%c2_20, %c1_21] : memref<4x6xf32, #tpu.memory_space<smem>>
    %c2_22 = arith.constant 2 : index
    %c2_23 = arith.constant 2 : index
    %14 = memref.load %arg3[%c2_22, %c2_23] : memref<4x6xf32, #tpu.memory_space<smem>>
    %c2_24 = arith.constant 2 : index
    %c3_25 = arith.constant 3 : index
    %15 = memref.load %arg3[%c2_24, %c3_25] : memref<4x6xf32, #tpu.memory_space<smem>>
    %c2_26 = arith.constant 2 : index
    %c4_27 = arith.constant 4 : index
    %16 = memref.load %arg3[%c2_26, %c4_27] : memref<4x6xf32, #tpu.memory_space<smem>>
    %c2_28 = arith.constant 2 : index
    %c5_29 = arith.constant 5 : index
    %17 = memref.load %arg3[%c2_28, %c5_29] : memref<4x6xf32, #tpu.memory_space<smem>>
    %c3_30 = arith.constant 3 : index
    %c0_31 = arith.constant 0 : index
    %18 = memref.load %arg3[%c3_30, %c0_31] : memref<4x6xf32, #tpu.memory_space<smem>>
    %c3_32 = arith.constant 3 : index
    %c1_33 = arith.constant 1 : index
    %19 = memref.load %arg3[%c3_32, %c1_33] : memref<4x6xf32, #tpu.memory_space<smem>>
    %c3_34 = arith.constant 3 : index
    %c2_35 = arith.constant 2 : index
    %20 = memref.load %arg3[%c3_34, %c2_35] : memref<4x6xf32, #tpu.memory_space<smem>>
    %c3_36 = arith.constant 3 : index
    %c3_37 = arith.constant 3 : index
    %21 = memref.load %arg3[%c3_36, %c3_37] : memref<4x6xf32, #tpu.memory_space<smem>>
    %c3_38 = arith.constant 3 : index
    %c4_39 = arith.constant 4 : index
    %22 = memref.load %arg3[%c3_38, %c4_39] : memref<4x6xf32, #tpu.memory_space<smem>>
    %c3_40 = arith.constant 3 : index
    %c5_41 = arith.constant 5 : index
    %23 = memref.load %arg3[%c3_40, %c5_41] : memref<4x6xf32, #tpu.memory_space<smem>>
    %c0_42 = arith.constant 0 : index
    %24 = memref.load %arg4[%c0_42] : memref<4xf32, #tpu.memory_space<smem>>
    %c1_43 = arith.constant 1 : index
    %25 = memref.load %arg4[%c1_43] : memref<4xf32, #tpu.memory_space<smem>>
    %c2_44 = arith.constant 2 : index
    %26 = memref.load %arg4[%c2_44] : memref<4xf32, #tpu.memory_space<smem>>
    %c3_45 = arith.constant 3 : index
    %27 = memref.load %arg4[%c3_45] : memref<4xf32, #tpu.memory_space<smem>>
    %c0_i32 = arith.constant 0 : i32
    %c16_i32 = arith.constant 16 : i32
    %28 = arith.addi %c0_i32, %c16_i32 : i32
    %c1_i32 = arith.constant 1 : i32
    scf.for %arg6 = %c0_i32 to %28 step %c1_i32  : i32 {
      %c16_i32_47 = arith.constant 16 : i32
      %29 = arith.muli %arg6, %c16_i32_47 : i32
      %30 = tpu.assume_multiple %29, 16 : i32
      %c0_48 = arith.constant 0 : index
      %31 = arith.index_cast %30 : i32 to index
      %c0_49 = arith.constant 0 : index
      %32 = vector.load %arg2[%c0_48, %31, %c0_49] : memref<6x256x512xf32, #tpu.memory_space<vmem>>, vector<1x16x512xf32>
      %33 = vector.shape_cast %32 : vector<1x16x512xf32> to vector<16x512xf32>
      %34 = vector.broadcast %0 : f32 to vector<16x512xf32>
      %35 = arith.mulf %33, %34 : vector<16x512xf32>
      %36 = vector.broadcast %24 : f32 to vector<16x512xf32>
      %37 = arith.addf %35, %36 : vector<16x512xf32>
      %38 = vector.broadcast %6 : f32 to vector<16x512xf32>
      %39 = arith.mulf %33, %38 : vector<16x512xf32>
      %40 = vector.broadcast %25 : f32 to vector<16x512xf32>
      %41 = arith.addf %39, %40 : vector<16x512xf32>
      %42 = vector.broadcast %12 : f32 to vector<16x512xf32>
      %43 = arith.mulf %33, %42 : vector<16x512xf32>
      %44 = vector.broadcast %26 : f32 to vector<16x512xf32>
      %45 = arith.addf %43, %44 : vector<16x512xf32>
      %46 = vector.broadcast %18 : f32 to vector<16x512xf32>
      %47 = arith.mulf %33, %46 : vector<16x512xf32>
      %48 = vector.broadcast %27 : f32 to vector<16x512xf32>
      %49 = arith.addf %47, %48 : vector<16x512xf32>
      %c1_50 = arith.constant 1 : index
      %50 = arith.index_cast %30 : i32 to index
      %c0_51 = arith.constant 0 : index
      %51 = vector.load %arg2[%c1_50, %50, %c0_51] : memref<6x256x512xf32, #tpu.memory_space<vmem>>, vector<1x16x512xf32>
      %52 = vector.shape_cast %51 : vector<1x16x512xf32> to vector<16x512xf32>
      %53 = vector.broadcast %1 : f32 to vector<16x512xf32>
      %54 = arith.mulf %53, %52 : vector<16x512xf32>
      %55 = arith.addf %37, %54 : vector<16x512xf32>
      %56 = vector.broadcast %7 : f32 to vector<16x512xf32>
      %57 = arith.mulf %56, %52 : vector<16x512xf32>
      %58 = arith.addf %41, %57 : vector<16x512xf32>
      %59 = vector.broadcast %13 : f32 to vector<16x512xf32>
      %60 = arith.mulf %59, %52 : vector<16x512xf32>
      %61 = arith.addf %45, %60 : vector<16x512xf32>
      %62 = vector.broadcast %19 : f32 to vector<16x512xf32>
      %63 = arith.mulf %62, %52 : vector<16x512xf32>
      %64 = arith.addf %49, %63 : vector<16x512xf32>
      %c2_52 = arith.constant 2 : index
      %65 = arith.index_cast %30 : i32 to index
      %c0_53 = arith.constant 0 : index
      %66 = vector.load %arg2[%c2_52, %65, %c0_53] : memref<6x256x512xf32, #tpu.memory_space<vmem>>, vector<1x16x512xf32>
      %67 = vector.shape_cast %66 : vector<1x16x512xf32> to vector<16x512xf32>
      %68 = vector.broadcast %2 : f32 to vector<16x512xf32>
      %69 = arith.mulf %68, %67 : vector<16x512xf32>
      %70 = arith.addf %55, %69 : vector<16x512xf32>
      %71 = vector.broadcast %8 : f32 to vector<16x512xf32>
      %72 = arith.mulf %71, %67 : vector<16x512xf32>
      %73 = arith.addf %58, %72 : vector<16x512xf32>
      %74 = vector.broadcast %14 : f32 to vector<16x512xf32>
      %75 = arith.mulf %74, %67 : vector<16x512xf32>
      %76 = arith.addf %61, %75 : vector<16x512xf32>
      %77 = vector.broadcast %20 : f32 to vector<16x512xf32>
      %78 = arith.mulf %77, %67 : vector<16x512xf32>
      %79 = arith.addf %64, %78 : vector<16x512xf32>
      %c3_54 = arith.constant 3 : index
      %80 = arith.index_cast %30 : i32 to index
      %c0_55 = arith.constant 0 : index
      %81 = vector.load %arg2[%c3_54, %80, %c0_55] : memref<6x256x512xf32, #tpu.memory_space<vmem>>, vector<1x16x512xf32>
      %82 = vector.shape_cast %81 : vector<1x16x512xf32> to vector<16x512xf32>
      %83 = vector.broadcast %3 : f32 to vector<16x512xf32>
      %84 = arith.mulf %83, %82 : vector<16x512xf32>
      %85 = arith.addf %70, %84 : vector<16x512xf32>
      %86 = vector.broadcast %9 : f32 to vector<16x512xf32>
      %87 = arith.mulf %86, %82 : vector<16x512xf32>
      %88 = arith.addf %73, %87 : vector<16x512xf32>
      %89 = vector.broadcast %15 : f32 to vector<16x512xf32>
      %90 = arith.mulf %89, %82 : vector<16x512xf32>
      %91 = arith.addf %76, %90 : vector<16x512xf32>
      %92 = vector.broadcast %21 : f32 to vector<16x512xf32>
      %93 = arith.mulf %92, %82 : vector<16x512xf32>
      %94 = arith.addf %79, %93 : vector<16x512xf32>
      %c4_56 = arith.constant 4 : index
      %95 = arith.index_cast %30 : i32 to index
      %c0_57 = arith.constant 0 : index
      %96 = vector.load %arg2[%c4_56, %95, %c0_57] : memref<6x256x512xf32, #tpu.memory_space<vmem>>, vector<1x16x512xf32>
      %97 = vector.shape_cast %96 : vector<1x16x512xf32> to vector<16x512xf32>
      %98 = vector.broadcast %4 : f32 to vector<16x512xf32>
      %99 = arith.mulf %98, %97 : vector<16x512xf32>
      %100 = arith.addf %85, %99 : vector<16x512xf32>
      %101 = vector.broadcast %10 : f32 to vector<16x512xf32>
      %102 = arith.mulf %101, %97 : vector<16x512xf32>
      %103 = arith.addf %88, %102 : vector<16x512xf32>
      %104 = vector.broadcast %16 : f32 to vector<16x512xf32>
      %105 = arith.mulf %104, %97 : vector<16x512xf32>
      %106 = arith.addf %91, %105 : vector<16x512xf32>
      %107 = vector.broadcast %22 : f32 to vector<16x512xf32>
      %108 = arith.mulf %107, %97 : vector<16x512xf32>
      %109 = arith.addf %94, %108 : vector<16x512xf32>
      %c5_58 = arith.constant 5 : index
      %110 = arith.index_cast %30 : i32 to index
      %c0_59 = arith.constant 0 : index
      %111 = vector.load %arg2[%c5_58, %110, %c0_59] : memref<6x256x512xf32, #tpu.memory_space<vmem>>, vector<1x16x512xf32>
      %112 = vector.shape_cast %111 : vector<1x16x512xf32> to vector<16x512xf32>
      %113 = vector.broadcast %5 : f32 to vector<16x512xf32>
      %114 = arith.mulf %113, %112 : vector<16x512xf32>
      %115 = arith.addf %100, %114 : vector<16x512xf32>
      %116 = vector.broadcast %11 : f32 to vector<16x512xf32>
      %117 = arith.mulf %116, %112 : vector<16x512xf32>
      %118 = arith.addf %103, %117 : vector<16x512xf32>
      %119 = vector.broadcast %17 : f32 to vector<16x512xf32>
      %120 = arith.mulf %119, %112 : vector<16x512xf32>
      %121 = arith.addf %106, %120 : vector<16x512xf32>
      %122 = vector.broadcast %23 : f32 to vector<16x512xf32>
      %123 = arith.mulf %122, %112 : vector<16x512xf32>
      %124 = arith.addf %109, %123 : vector<16x512xf32>
      %c0_60 = arith.constant 0 : index
      %125 = arith.index_cast %30 : i32 to index
      %c0_61 = arith.constant 0 : index
      %126 = vector.load %arg5[%c0_60, %125, %c0_61] : memref<4x256x512xf32, #tpu.memory_space<vmem>>, vector<1x16x512xf32>
      %127 = vector.shape_cast %126 : vector<1x16x512xf32> to vector<16x512xf32>
      %128 = vector.shape_cast %115 : vector<16x512xf32> to vector<1x16x512xf32>
      tpu.vector_store %arg5[%c0_60, %125, %c0_61], %128 {strides = array<i32>} : memref<4x256x512xf32, #tpu.memory_space<vmem>>, vector<1x16x512xf32>,
      %c1_62 = arith.constant 1 : index
      %129 = arith.index_cast %30 : i32 to index
      %c0_63 = arith.constant 0 : index
      %130 = vector.load %arg5[%c1_62, %129, %c0_63] : memref<4x256x512xf32, #tpu.memory_space<vmem>>, vector<1x16x512xf32>
      %131 = vector.shape_cast %130 : vector<1x16x512xf32> to vector<16x512xf32>
      %132 = vector.shape_cast %118 : vector<16x512xf32> to vector<1x16x512xf32>
      tpu.vector_store %arg5[%c1_62, %129, %c0_63], %132 {strides = array<i32>} : memref<4x256x512xf32, #tpu.memory_space<vmem>>, vector<1x16x512xf32>,
      %c2_64 = arith.constant 2 : index
      %133 = arith.index_cast %30 : i32 to index
      %c0_65 = arith.constant 0 : index
      %134 = vector.load %arg5[%c2_64, %133, %c0_65] : memref<4x256x512xf32, #tpu.memory_space<vmem>>, vector<1x16x512xf32>
      %135 = vector.shape_cast %134 : vector<1x16x512xf32> to vector<16x512xf32>
      %136 = vector.shape_cast %121 : vector<16x512xf32> to vector<1x16x512xf32>
      tpu.vector_store %arg5[%c2_64, %133, %c0_65], %136 {strides = array<i32>} : memref<4x256x512xf32, #tpu.memory_space<vmem>>, vector<1x16x512xf32>,
      %c3_66 = arith.constant 3 : index
      %137 = arith.index_cast %30 : i32 to index
      %c0_67 = arith.constant 0 : index
      %138 = vector.load %arg5[%c3_66, %137, %c0_67] : memref<4x256x512xf32, #tpu.memory_space<vmem>>, vector<1x16x512xf32>
      %139 = vector.shape_cast %138 : vector<1x16x512xf32> to vector<16x512xf32>
      %140 = vector.shape_cast %124 : vector<16x512xf32> to vector<1x16x512xf32>
      tpu.vector_store %arg5[%c3_66, %137, %c0_67], %140 {strides = array<i32>} : memref<4x256x512xf32, #tpu.memory_space<vmem>>, vector<1x16x512xf32>,
    }
    %c16_i32_46 = arith.constant 16 : i32
    return
  }
  func.func @transform_0(%arg0: i32, %arg1: i32) -> (i32, i32, i32) {
    %c0_i32 = arith.constant 0 : i32
    %c0_i32_0 = arith.constant 0 : i32
    return %c0_i32, %arg0, %arg1 : i32, i32, i32
  }
  func.func @transform_1(%arg0: i32, %arg1: i32) -> (i32, i32) {
    %c0_i32 = arith.constant 0 : i32
    %c0_i32_0 = arith.constant 0 : i32
    %c0_i32_1 = arith.constant 0 : i32
    return %c0_i32, %c0_i32_0 : i32, i32
  }
  func.func @transform_2(%arg0: i32, %arg1: i32) -> i32 {
    %c0_i32 = arith.constant 0 : i32
    %c0_i32_0 = arith.constant 0 : i32
    return %c0_i32 : i32
  }
  func.func @transform_3(%arg0: i32, %arg1: i32) -> (i32, i32, i32) {
    %c0_i32 = arith.constant 0 : i32
    %c0_i32_0 = arith.constant 0 : i32
    return %c0_i32, %arg0, %arg1 : i32, i32, i32
  }
}

</mosaic_0001>

<bundles_post_ra>
// kernel: tpu_custom_call.1
= control target key start
LH: loop header
LB: loop body
LE: loop exit
PB: predicated region body
PF: predicated region fallthrough
CT: control target
= control target key end

     0   :  { %s2346_s0 = inlined_call_operand.hbm [shape: f32[6,512,512], index: 0, kind: input, shape index: {}]   ;;  %s2347_s1 = inlined_call_operand.hbm [shape: f32[4,6], index: 1, kind: input, shape index: {}]   ;;  %s2348_s2 = inlined_call_operand.hbm [shape: f32[4], index: 2, kind: input, shape index: {}]   ;;  %s2349_s3 = inlined_call_operand.hbm [shape: f32[4,512,512], index: 3, kind: output, shape index: {}]  }
   0x1   :  { %2419 = sst [smem:[#allocation64_spill]] %s2346_s0 }
   0x2   :  { %2420 = sst [smem:[#allocation65_spill]] %s2347_s1 }
   0x3   :  { %2421 = sst [smem:[#allocation66_spill]] %s2348_s2 }
   0x4   :  { %2422 = sst [smem:[#allocation67_spill]] %s2349_s3 }
   0x5   :  { %8 = vsyncpa [#allocation3], 0 }
   0x6   :  { %10 = vsyncpa [#allocation3 + $0x1], 0 }
   0x7   :  { %11 = vsyncpa [#allocation5], 0 }
   0x8   :  { %12 = vsyncpa [#allocation8], 0 }
   0x9   :  { %13 = vsyncpa [#allocation4], 0 }
   0xa   :  { %15 = vsyncpa [#allocation4 + $0x1], 0  ;;  %s1405_s12 = smov 0   ;;  %s1407_s13 = smov 0  }
   0xb   :  { %s1409_s14 = smov 0   ;;  %s1411_s15 = smov 0  }
   0xc   :  { %s1413_s16 = smov 0   ;;  %s1415_s17 = smov 0  }
   0xd LB: > { %2423 = sst [smem:[#allocation19_spill]] %s1346_s12  ;;  %s1013_s18 = sadd.s32 4294967295, %s1366_s17   ;;  %s1366_s17 = sphi %s1415_s17, %s21_s17   ;;  %s1362_s16 = sphi %s1413_s16, %s2542_s16   ;;  %s1358_s15 = sphi %s1411_s15, %s2541_s15   ;;  %s1354_s14 = sphi %s1409_s14, %s2540_s14   ;;  %s1350_s13 = sphi %s1407_s13, %s2539_s13   ;;  %s1346_s12 = sphi %s1405_s12, %s2538_s12  }
   0xe   : > { %2424 = sst [smem:[#allocation20_spill]] %s1350_s13  ;;  %s1014_s19 = sadd.s32 4294967294, %s1366_s17  }
   0xf   : > { %2425 = sst [smem:[#allocation21_spill]] %s1354_s14  ;;  %s33_s20 = sadd.s32 1, %s1362_s16 }
  0x10   : > { %2426 = sst [smem:[#allocation22_spill]] %s1358_s15  ;;  %s42_s21 = sadd.s32 1, %s1354_s14 }
  0x11   : > { %2427 = sst [smem:[#allocation23_spill]] %s1362_s16  ;;  %p35_p0 = scmp.ge.s32.totalorder %s33_s20, 2 }
  0x12   : > { %2428 = sst [smem:[#allocation24_spill]] %s1366_s17  ;;  %p49_p1 = scmp.ne.s32.totalorder %s1354_s14, %s1350_s13 }
  0x13   : > { %p50_p2 = scmp.eq.s32.totalorder %s1366_s17, 0  ;;  %p55_p3 = scmp.ne.s32.totalorder %s1350_s13, %s1346_s12 }
  0x14   : > { %s2544_s20 = smov (%p35_p0, %s33_s20), 0  ;;  %p1450_p5 = scmp.eq.s32.totalorder %s1013_s18, 0 }
  0x15   : > { %2429 = sst [smem:[#allocation25_spill]] %s2544_s20  ;;  %p1446_p4 = por %p50_p2, %p49_p1 }
  0x16   : > { %s37_s24 = ssub.s32 %s1362_s16, %s2544_s20  ;;  %p123_p6 = scmp.eq.s32.totalorder %s1013_s18, 1 }
  0x17   : > { %p40_p7 = scmp.eq.s32.totalorder %s37_s24, 0  ;;  %p1458_p8 = por %p1450_p5, %p55_p3 }
  0x18   : > { %p1462_p9 = por %p123_p6, %p49_p1  ;;  %p129_p10 = scmp.eq.s32.totalorder %s1014_s19, 1 }
  0x19   : > { %s1467_s27 = scalar_select %p40_p7, %s1354_s14, %s42_s21  }
  0x1a   : > { %s2433_s26 = scalar_select %p1462_p9, 1, 0 }
  0x1b   : > { %2435 = sst [smem:[#allocation27_spill]] %s1467_s27  ;;  %p1469_p11 = por %p129_p10, %p55_p3 }
  0x1c   : > { %2434 = sst [smem:[#allocation26_spill]] %s2433_s26  ;;  %p1015_p12 = scmp.ge.s32.totalorder %s1366_s17, 1 }
  0x1d   : > { %s2436_s28 = scalar_select %p1469_p11, 1, 0 }
  0x1e   : > { %p136_p13 = scmp.lt.s32.totalorder %s1366_s17, 3  ;;  %s2439_s1 = sld [smem:[#allocation65_spill]] }
  0x1f   : > { %2437 = sst [smem:[#allocation28_spill]] %s2436_s28  ;;  %s1372_s9 = smov [#allocation6]  }
  0x20   : > { %p1475_p0 = pnand %p1015_p12, %p136_p13  ;;  %s2440_s2 = sld [smem:[#allocation66_spill]] }
  0x21   : > { %s1373_s10 = smov [#allocation7]   ;;  %p1018_p3 = scmp.ge.s32.totalorder %s1366_s17, 2 }
  0x22   : > { %p1185_p1 = pneg %p1475_p0 }
  0x24   : > { %s148_s5 = sshll.u32 %s2439_s1, 4  ;;  %p1186_p2 = pnand %p1185_p1, %p1450_p5  ;;  %s149_s5 = int_to_ptr.hbm [resolvable:$true] %s148_s5 }
  0x25   : > { %165 = sbr.rel (%p1018_p3) target bundleno = 56 (0x38), region = 24 }
  0x26   : > { %s158_s8 = sshll.u32 %s2440_s2, 4  ;;  %s159_s8 = int_to_ptr.hbm [resolvable:$true] %s158_s8 }
  0x27   : > { %1188 = dma.hbm_to_smem (!%p1186_p2), %s149_s5, 64, %s1372_s9, [#allocation5]  }
  0x28   : > { %1191 = dma.hbm_to_smem (!%p1186_p2), %s159_s8, 16, %s1373_s10, [#allocation8]  }
  0x2a   : > { %s169_s11 = sand.u32 1, %s1354_s14   ;;  %s1145_s18 = sshll.u32 %s1362_s16, 10 }
  0x2b   : > { %s1158_s19 = smul.u32 6144, %s169_s11  ;;  %s2441_s0 = sld [smem:[#allocation64_spill]] }
  0x2c   : > { %s1164_s5 = scalar_select %p1446_p4, [#allocation0], [#allocation14] }
  0x2d   : > { %s173_s7 = scalar_lea.vmem [#allocation2], %s1158_s19  ;;  %s1374_s9 = smov 32768  }
  0x2e   : > { %s186_s6 = sld [smem:[%s1164_s5]]   ;;  %s196_s8 = sshll.u32 %s173_s7, 4  ;;  %s197_s8 = int_to_ptr.vmem [resolvable:$true] %s196_s8 }
  0x2f   : > { %1165 = sst [smem:[#allocation11]] (%p1446_p4), %s1374_s9  ;;  %s1375_s10 = smov 16384  }
  0x30   : > { %1166 = sst [smem:[#allocation11 + $0x1]] (%p1446_p4), %s1375_s10  ;;  %s1376_s1 = smov 32  }
  0x31   : > { %s181_s30 = scalar_lea.hbm %s2441_s0, %s1145_s18  ;;  %1167 = sst [smem:[#allocation11 + $0x2]] (%p1446_p4), %s1376_s1 }
  0x32   : > { %s194_s4 = sshll.u32 %s181_s30, 4  ;;  %s1377_s18 = smov 512   ;;  %s195_s4 = int_to_ptr.hbm [resolvable:$true] %s194_s4 }
  0x33   : > { %1168 = sst [smem:[#allocation11 + $0x3]] (%p1446_p4), %s1377_s18  ;;  %s170_s24 = scalar_lea.sflag [#allocation3], %s169_s11 }
  0x34   : > { %1169 = sst [smem:[#allocation11 + $0x4]] (%p1446_p4), %s1377_s18  ;;  %s1022_s21 = sshll.u32 %s186_s6, 26 }
  0x35   : > { %1170 = sst [smem:[#allocation11 + $0x5]] (%p1446_p4), %s1376_s1  ;;  %s1023_s19 = sadd.s32 134217728, %s1022_s21 }
  0x36   : > { %s1378_s30 = smov [#allocation10]  }
  0x37   : > { %1171 = dma.general (%p1446_p4), %s195_s4, 98304, %s197_s8, %s170_s24, %s1378_s30, [#allocation11], %s1023_s19, 0  }
  0x38 PF: > { %221 = sbr.rel (%p1475_p0) target bundleno = 237 (0xed), region = 32 }
  0x3d   : > { %s1516_s5 = sand.u32 1, %s1350_s13  }
  0x3e   : > { %2442 = sst [smem:[#allocation29_spill]] %s1516_s5  ;;  %s1159_s7 = smul.u32 6144, %s1516_s5 }
  0x3f   : > { %s224_s9 = scalar_lea.sflag [#allocation3], %s1516_s5 }
  0x40   : > { %s1520_s6 = scalar_lea.vmem [#allocation2], %s1159_s7 }
  0x41   : > { %1329 = dma.done.wait (%p1458_p8), %s224_s9, 98304  }
  0x42   : > { %1331 = vsyncadd (%p1458_p8), %s224_s9, 4294868992 }
  0x43   : > { %1333 = dma.done.wait (%p1450_p5), [#allocation5], 64  }
  0x44   : > { %1335 = vsyncadd (%p1450_p5), [#allocation5], 4294967232 }
  0x45   : > { %1337 = dma.done.wait (%p1450_p5), [#allocation8], 16  }
  0x46   : > { %1339 = vsyncadd (%p1450_p5), [#allocation8], 4294967280 }
  0x47   : > { %243 = sfence }
  0x48   : > { %s1027_s1 = sshll.u32 %s1516_s5, 12  ;;  %s1535_s22 = sld [smem:[#allocation6]] }
  0x49   : > { %s1537_s29 = sld [smem:[#allocation6 + $0x1]]  ;;  %s1591_s5 = scalar_lea.vmem [#allocation9], %s1027_s1 }
  0x4a   : > { %s1539_s25 = sld [smem:[#allocation6 + $0x2]] }
  0x4b   : > { %s1541_s11 = sld [smem:[#allocation6 + $0x3]] }
  0x4c   : > { %s1543_s4 = sld [smem:[#allocation6 + $0x4]] }
  0x4d   : > { %s1545_s8 = sld [smem:[#allocation6 + $0x5]] }
  0x4e   : > { %s1547_s10 = sld [smem:[#allocation6 + $0x80]] }
  0x4f   : > { %s1549_s18 = sld [smem:[#allocation6 + $0x81]] }
  0x50   : > { %s1551_s23 = sld [smem:[#allocation6 + $0x82]] }
  0x51   : > { %s1553_s21 = sld [smem:[#allocation6 + $0x83]] }
  0x52   : > { %s1555_s19 = sld [smem:[#allocation6 + $0x84]] }
  0x53   : > { %s1557_s24 = sld [smem:[#allocation6 + $0x85]] }
  0x54   : > { %s1559_s30 = sld [smem:[#allocation6 + $0x100]] }
  0x55   : > { %s1561_s7 = sld [smem:[#allocation6 + $0x101]] }
  0x56   : > { %s1563_s9 = sld [smem:[#allocation6 + $0x102]] }
  0x57   : > { %s1565_s0 = sld [smem:[#allocation6 + $0x103]] }
  0x58   : > { %s1567_s2 = sld [smem:[#allocation6 + $0x104]] }
  0x59   : > { %s1569_s20 = sld [smem:[#allocation6 + $0x105]] }
  0x5a   : > { %s1571_s16 = sld [smem:[#allocation6 + $0x180]] }
  0x5b   : > { %s1573_s27 = sld [smem:[#allocation6 + $0x181]] }
  0x5c   : > { %s1575_s14 = sld [smem:[#allocation6 + $0x182]] }
  0x5d   : > { %s1577_s13 = sld [smem:[#allocation6 + $0x183]] }
  0x5e   : > { %s1579_s17 = sld [smem:[#allocation6 + $0x184]] }
  0x5f   : > { %s1581_s28 = sld [smem:[#allocation6 + $0x185]] }
  0x60   : > { %2443 = sst [smem:[#allocation30_spill]] %s1571_s16  ;;  %s1593_s16 = smov 0  }
  0x61   : > { %s1583_s12 = sld [smem:[#allocation7]] }
  0x62   : > { %s1585_s3 = sld [smem:[#allocation7 + $0x1]] }
  0x63   : > { %s1587_s26 = sld [smem:[#allocation7 + $0x2]] }
  0x64   : > { %2444 = sst [smem:[#allocation31_spill]] %s1579_s17 }
  0x65   : > { %2445 = sst [smem:[#allocation32_spill]] %s1581_s28 }
  0x66   : > { %s1589_s15 = sld [smem:[#allocation7 + $0x3]] }
  0x68   : > { %2446 = sst [smem:[#allocation33_spill]] %s1585_s3 }
  0x69 LB: >> { %s2447_s3 = sld [smem:[#allocation33_spill]]  ;;  %s1054_s1 = sshll.u32 %s1370_s16, 4  ;;  %v1602_v0 = vstv %s1535_s22  ;;  %v1605_v1 = vstv %s1583_s12  ;;  %v1608_v2 = vstv %s1537_s29  ;;  %v1611_v3 = vstv %s1539_s25  ;;  %s1370_s16 = sphi %s1593_s16, %s299_s16  }
  0x6a   : >> { %s1599_s28 = sshra.s32 %s1054_s1, 3  ;;  %v1615_v4 = vstv %s1541_s11  ;;  %v1618_v5 = vstv %s1543_s4  ;;  %v1621_v6 = vstv %s1545_s8  ;;  %v1624_v7 = vstv %s1547_s10  ;;  %s299_s16 = sadd.s32 1, %s1370_s16  }
  0x6b   : >> { %s1146_s17 = sshll.u32 %s1599_s28, 5  ;;  %v1635_v9 = vstv %s1549_s18  ;;  %v1638_v10 = vstv %s1551_s23  ;;  %v1641_v11 = vstv %s1553_s21  ;;  %v1653_v15 = vstv %s1555_s19  ;;  %s2512_s28 = sld [smem:[#allocation31_spill]] }
  0x6c   : >> { %s1629_s1 = scalar_lea.vmem %s1520_s6, %s1146_s17 [#allocation2]  ;;  %v1671_v22 = vstv %s1557_s24  ;;  %p296_p4 = scmp.ge.s32.totalorder %s299_s16, 16  }
  0x6d   : >> { %v1644_v12 = vld [vmem:[%s1629_s1] sm:$0xff]  ;;  %v1682_v26 = vld [vmem:[%s1629_s1 + $0x8] sm:$0xff]  ;;  %v1721_v41 = vld [vmem:[%s1629_s1 + $0x10] sm:$0xff] }
  0x6e   : >> { %2448 = vst [vmem:[#allocation34_spill] sm:$0xff] %v1644_v12  ;;  %v1647_v13 = vld [vmem:[%s1629_s1 + $0x400] sm:$0xff]  ;;  %v315_v16 = vmul.f32 %v1602_v0, %v1644_v12  ;;  %v1685_v27 = vld [vmem:[%s1629_s1 + $0x408] sm:$0xff]  ;;  %v333_v29 = vmul.f32 %v1624_v7, %v1644_v12  ;;  %v316_v31 = vmul.f32 %v1602_v0, %v1682_v26  ;;  %v1724_v42 = vld [vmem:[%s1629_s1 + $0x410] sm:$0xff]  ;;  %v317_v46 = vmul.f32 %v1602_v0, %v1721_v41 }
  0x6f   : >> { %v1632_v8 = vstv %s2447_s3  ;;  %2449 = vst [vmem:[#allocation35_spill] sm:$0xff] %v1647_v13  ;;  %v1650_v14 = vld [vmem:[%s1629_s1 + $0x800] sm:$0xff]  ;;  %v398_v17 = vmul.f32 %v1647_v13, %v1608_v2  ;;  %v1688_v28 = vld [vmem:[%s1629_s1 + $0x808] sm:$0xff]  ;;  %v399_v32 = vmul.f32 %v1685_v27, %v1608_v2  ;;  %v1708_v36 = vmul.f32 %v1647_v13, %v1635_v9  ;;  %v1727_v43 = vld [vmem:[%s1629_s1 + $0x810] sm:$0xff]  ;;  %s1817_s3 = scalar_lea.vmem %s1591_s5, %s1146_s17 [#allocation9]  ;;  %s2511_s17 = sld [smem:[#allocation30_spill]] }
  0x70   : >> { %v477_v18 = vmul.f32 %v1650_v14, %v1611_v3  ;;  %v1662_v19 = vld [vmem:[%s1629_s1 + $0xc00] sm:$0xff]  ;;  %v324_v30 = vadd.f32 %v1605_v1, %v315_v16  ;;  %v1698_v33 = vld [vmem:[%s1629_s1 + $0xc08] sm:$0xff]  ;;  %v478_v37 = vmul.f32 %v1688_v28, %v1611_v3  ;;  %2452 = vst [vmem:[#allocation38_spill] sm:$0xff] %v1724_v42  ;;  %v325_v45 = vadd.f32 %v1605_v1, %v316_v31  ;;  %v1735_v48 = vld [vmem:[%s1629_s1 + $0xc10] sm:$0xff] }
  0x71   : >> { %v1665_v20 = vld [vmem:[%s1629_s1 + $0x1000] sm:$0xff]  ;;  %v556_v23 = vmul.f32 %v1662_v19, %v1615_v4  ;;  %v1701_v34 = vld [vmem:[%s1629_s1 + $0x1008] sm:$0xff]  ;;  %v557_v38 = vmul.f32 %v1698_v33, %v1615_v4  ;;  %2453 = vst [vmem:[#allocation39_spill] sm:$0xff] %v1727_v43  ;;  %v400_v47 = vmul.f32 %v1724_v42, %v1608_v2  ;;  %v1738_v49 = vld [vmem:[%s1629_s1 + $0x1010] sm:$0xff]  ;;  %v479_v51 = vmul.f32 %v1727_v43, %v1611_v3 }
  0x72   : >> { %v1668_v21 = vld [vmem:[%s1629_s1 + $0x1400] sm:$0xff]  ;;  %v635_v24 = vmul.f32 %v1665_v20, %v1618_v5  ;;  %2450 = vst [vmem:[#allocation36_spill] sm:$0xff] %v1701_v34  ;;  %v1704_v35 = vld [vmem:[%s1629_s1 + $0x1408] sm:$0xff]  ;;  %v636_v39 = vmul.f32 %v1701_v34, %v1618_v5  ;;  %v406_v44 = vadd.f32 %v398_v17, %v324_v30  ;;  %v1741_v50 = vld [vmem:[%s1629_s1 + $0x1410] sm:$0xff]  ;;  %v558_v52 = vmul.f32 %v1735_v48, %v1615_v4 }
  0x73   : >> { %v1679_v25 = vmul.f32 %v1668_v21, %v1621_v6  ;;  %2451 = vst [vmem:[#allocation37_spill] sm:$0xff] %v1704_v35  ;;  %v1718_v40 = vmul.f32 %v1704_v35, %v1621_v6  ;;  %v637_v53 = vmul.f32 %v1738_v49, %v1618_v5  ;;  %v1750_v54 = vld [vmem:[%s1629_s1 + $0x18] sm:$0xff]  ;;  %v1759_v57 = vadd.f32 %v1632_v8, %v333_v29  ;;  %v1782_v31 = vld [vmem:[%s1629_s1 + $0x20] sm:$0xff] }
  0x74   : >> { %2454 = vst [vmem:[#allocation40_spill] sm:$0xff] %v1735_v48  ;;  %v1753_v55 = vld [vmem:[%s1629_s1 + $0x418] sm:$0xff]  ;;  %v485_v58 = vadd.f32 %v477_v18, %v406_v44  ;;  %v407_v59 = vadd.f32 %v399_v32, %v325_v45  ;;  %v326_v60 = vadd.f32 %v1605_v1, %v317_v46  ;;  %v318_v61 = vmul.f32 %v1602_v0, %v1750_v54  ;;  %v1785_v32 = vld [vmem:[%s1629_s1 + $0x420] sm:$0xff] }
  0x75   : >> { %2455 = vst [vmem:[#allocation41_spill] sm:$0xff] %v1738_v49  ;;  %v1756_v56 = vld [vmem:[%s1629_s1 + $0x818] sm:$0xff]  ;;  %v716_v17 = vmul.f32 %v1741_v50, %v1621_v6  ;;  %v401_v18 = vmul.f32 %v1753_v55, %v1608_v2  ;;  %v1789_v12 = vld [vmem:[%s1629_s1 + $0x820] sm:$0xff] }
  0x76   : >> { %2456 = vst [vmem:[#allocation42_spill] sm:$0xff] %v1741_v50  ;;  %v1765_v62 = vld [vmem:[%s1629_s1 + $0xc18] sm:$0xff]  ;;  %v480_v29 = vmul.f32 %v1756_v56, %v1611_v3  ;;  %v564_v44 = vadd.f32 %v556_v23, %v485_v58  ;;  %v486_v45 = vadd.f32 %v478_v37, %v407_v59  ;;  %v408_v46 = vadd.f32 %v400_v47, %v326_v60  ;;  %v1806_v50 = vld [vmem:[%s1629_s1 + $0x1420] sm:$0xff] }
  0x77   : >> { %2457 = vst [vmem:[#allocation43_spill] sm:$0xff] %v1750_v54  ;;  %v1768_v63 = vld [vmem:[%s1629_s1 + $0x1018] sm:$0xff]  ;;  %v559_v30 = vmul.f32 %v1765_v62, %v1615_v4  ;;  %v327_v13 = vadd.f32 %v1605_v1, %v318_v61  ;;  %v319_v37 = vmul.f32 %v1602_v0, %v1782_v31  ;;  %v402_v47 = vmul.f32 %v1785_v32, %v1608_v2  ;;  %v1809_v54 = vld [vmem:[%s1629_s1 + $0x28] sm:$0xff] }
  0x78   : >> { %2458 = vst [vmem:[#allocation44_spill] sm:$0xff] %v1753_v55  ;;  %v1771_v16 = vld [vmem:[%s1629_s1 + $0x1418] sm:$0xff]  ;;  %v1795_v55 = vld [vmem:[%s1629_s1 + $0x1020] sm:$0xff]  ;;  %v643_v58 = vadd.f32 %v635_v24, %v564_v44  ;;  %v565_v59 = vadd.f32 %v557_v38, %v486_v45  ;;  %v487_v60 = vadd.f32 %v479_v51, %v408_v46  ;;  %v481_v24 = vmul.f32 %v1789_v12, %v1611_v3  ;;  %v1827_v51 = vld [vmem:[%s1629_s1 + $0x828] sm:$0xff] }
  0x79   : >> { %2459 = vst [vmem:[#allocation45_spill] sm:$0xff] %v1756_v56  ;;  %v1792_v56 = vld [vmem:[%s1629_s1 + $0xc20] sm:$0xff]  ;;  %v717_v23 = vmul.f32 %v1771_v16, %v1621_v6  ;;  %v409_v61 = vadd.f32 %v401_v18, %v327_v13  ;;  %v639_v38 = vmul.f32 %v1795_v55, %v1618_v5 }
  0x7a   : >> { %2460 = vst [vmem:[#allocation46_spill] sm:$0xff] %v1765_v62  ;;  %v638_v62 = vmul.f32 %v1768_v63, %v1618_v5  ;;  %v560_v13 = vmul.f32 %v1792_v56, %v1615_v4  ;;  %v722_v18 = vadd.f32 %v1679_v25, %v643_v58  ;;  %v644_v44 = vadd.f32 %v636_v39, %v565_v59  ;;  %v1843_v39 = vld [vmem:[%s1629_s1 + $0x30] sm:$0xff]  ;;  %v1853_v59 = vld [vmem:[%s1629_s1 + $0x1428] sm:$0xff] }
  0x7b   : >> { %2461 = vst [vmem:[#allocation47_spill] sm:$0xff] %v1768_v63  ;;  %v1812_v63 = vld [vmem:[%s1629_s1 + $0x428] sm:$0xff]  ;;  %v566_v45 = vadd.f32 %v558_v52, %v487_v60  ;;  %v488_v46 = vadd.f32 %v480_v29, %v409_v61  ;;  %v1846_v52 = vld [vmem:[%s1629_s1 + $0x430] sm:$0xff]  ;;  %v482_v58 = vmul.f32 %v1827_v51, %v1611_v3 }
  0x7c   : >> { %2462 = vst [vmem:[#allocation48_spill] sm:$0xff] %v1771_v16  ;;  %v328_v16 = vadd.f32 %v1605_v1, %v319_v37  ;;  %v1831_v37 = vld [vmem:[%s1629_s1 + $0xc28] sm:$0xff]  ;;  %v403_v25 = vmul.f32 %v1812_v63, %v1608_v2  ;;  %v723_v29 = vadd.f32 %v1718_v40, %v644_v44  ;;  %v1856_v60 = vld [vmem:[%s1629_s1 + $0x830] sm:$0xff] }
  0x7d   : >> { %2463 = vst [vmem:[#allocation49_spill] sm:$0xff] %v1782_v31 }
  0x7e   : >> { %2464 = vst [vmem:[#allocation50_spill] sm:$0xff] %v1785_v32  ;;  %v1834_v32 = vld [vmem:[%s1629_s1 + $0x1028] sm:$0xff] }
  0x7f   : >> { %2465 = vst [vmem:[#allocation51_spill] sm:$0xff] %v1789_v12  ;;  %v410_v12 = vadd.f32 %v402_v47, %v328_v16  ;;  %v645_v16 = vadd.f32 %v637_v53, %v566_v45  ;;  %v567_v47 = vadd.f32 %v559_v30, %v488_v46  ;;  %v640_v40 = vmul.f32 %v1834_v32, %v1618_v5  ;;  %v1864_v53 = vld [vmem:[%s1629_s1 + $0xc30] sm:$0xff]  ;;  %v1878_v46 = vld [vmem:[%s1629_s1 + $0x438] sm:$0xff] }
  0x80   : >> { %2466 = vst [vmem:[#allocation52_spill] sm:$0xff] %v1792_v56  ;;  %v718_v56 = vmul.f32 %v1806_v50, %v1621_v6  ;;  %v1867_v30 = vld [vmem:[%s1629_s1 + $0x1030] sm:$0xff] }
  0x81   : >> { %2467 = vst [vmem:[#allocation53_spill] sm:$0xff] %v1795_v55  ;;  %v320_v55 = vmul.f32 %v1602_v0, %v1809_v54  ;;  %v489_v61 = vadd.f32 %v481_v24, %v410_v12  ;;  %v724_v44 = vadd.f32 %v716_v17, %v645_v16  ;;  %v646_v45 = vadd.f32 %v638_v62, %v567_v47  ;;  %v1875_v24 = vld [vmem:[%s1629_s1 + $0x38] sm:$0xff]  ;;  %v1885_v17 = vld [vmem:[%s1629_s1 + $0x1430] sm:$0xff] }
  0x82   : >> { %2468 = vst [vmem:[#allocation54_spill] sm:$0xff] %v1806_v50  ;;  %v321_v12 = vmul.f32 %v1602_v0, %v1843_v39  ;;  %v483_v62 = vmul.f32 %v1856_v60, %v1611_v3  ;;  %v1891_v16 = vld [vmem:[%s1629_s1 + $0xc38] sm:$0xff] }
  0x83   : >> { %2469 = vst [vmem:[#allocation55_spill] sm:$0xff] %v1809_v54  ;;  %v329_v50 = vadd.f32 %v1605_v1, %v320_v55  ;;  %v404_v55 = vmul.f32 %v1846_v52, %v1608_v2  ;;  %v725_v47 = vadd.f32 %v717_v23, %v646_v45  ;;  %v720_v45 = vmul.f32 %v1885_v17, %v1621_v6 }
  0x84   : >> { %2470 = vst [vmem:[#allocation56_spill] sm:$0xff] %v1812_v63 }
  0x85   : >> { %2471 = vst [vmem:[#allocation57_spill] sm:$0xff] %v1827_v51  ;;  %v719_v51 = vmul.f32 %v1853_v59, %v1621_v6 }
  0x86   : >> { %2472 = vst [vmem:[#allocation58_spill] sm:$0xff] %v1831_v37 }
  0x87   : >> { %2473 = vst [vmem:[#allocation59_spill] sm:$0xff] %v1834_v32  ;;  %v568_v32 = vadd.f32 %v560_v13, %v489_v61  ;;  %v641_v13 = vmul.f32 %v1867_v30, %v1618_v5 }
  0x88   : >> { %2474 = vst [vmem:[#allocation60_spill] sm:$0xff] %v1846_v52  ;;  %v330_v52 = vadd.f32 %v1605_v1, %v321_v12 }
  0x89   : >> { %783 = vst [vmem:[%s1817_s3] sm:$0xff] %v722_v18  ;;  %v561_v18 = vmul.f32 %v1831_v37, %v1615_v4  ;;  %v411_v37 = vadd.f32 %v403_v25, %v329_v50  ;;  %v562_v50 = vmul.f32 %v1864_v53, %v1615_v4  ;;  %v1900_v25 = vld [vmem:[%s1629_s1 + $0x1038] sm:$0xff]  ;;  %v647_v61 = vadd.f32 %v639_v38, %v568_v32 }
  0x8a   : >> { %2475 = vst [vmem:[#allocation61_spill] sm:$0xff] %v1853_v59  ;;  %v322_v59 = vmul.f32 %v1602_v0, %v1875_v24  ;;  %v412_v23 = vadd.f32 %v404_v55, %v330_v52  ;;  %v1914_v32 = vld [vmem:[%s1629_s1 + $0x1438] sm:$0xff]  ;;  %v423_v52 = vadd.f32 %v1708_v36, %v1759_v57  ;;  %v494_v55 = vmul.f32 %v1650_v14, %v1638_v10 }
  0x8b   : >> { %2476 = vst [vmem:[#allocation62_spill] sm:$0xff] %v1856_v60  ;;  %v490_v60 = vadd.f32 %v482_v58, %v411_v37  ;;  %v726_v38 = vadd.f32 %v718_v56, %v647_v61  ;;  %v334_v36 = vmul.f32 %v1624_v7, %v1682_v26  ;;  %v416_v57 = vmul.f32 %v1685_v27, %v1635_v9 }
  0x8c   : >> { %2477 = vst [vmem:[#allocation63_spill] sm:$0xff] %v1867_v30  ;;  %v563_v30 = vmul.f32 %v1891_v16, %v1615_v4  ;;  %v331_v0 = vadd.f32 %v1605_v1, %v322_v59  ;;  %v491_v58 = vadd.f32 %v483_v62, %v412_v23  ;;  %v721_v1 = vmul.f32 %v1914_v32, %v1621_v6 }
  0x8d   : >> { %784 = vst [vmem:[%s1817_s3 + $0x8] sm:$0xff] %v723_v29  ;;  %v1888_v29 = vld [vmem:[%s1629_s1 + $0x838] sm:$0xff]  ;;  %v569_v37 = vadd.f32 %v561_v18, %v490_v60  ;;  %v502_v60 = vadd.f32 %v494_v55, %v423_v52  ;;  %s2513_s1 = sld [smem:[#allocation32_spill]] }
  0x8e   : >> { %785 = vst [vmem:[%s1817_s3 + $0x10] sm:$0xff] %v724_v44  ;;  %v405_v44 = vmul.f32 %v1878_v46, %v1608_v2  ;;  %v484_v12 = vmul.f32 %v1888_v29, %v1611_v3  ;;  %v642_v2 = vmul.f32 %v1900_v25, %v1618_v5  ;;  %v573_v3 = vmul.f32 %v1662_v19, %v1641_v11 }
  0x8f   : >> { %786 = vst [vmem:[%s1817_s3 + $0x18] sm:$0xff] %v725_v47  ;;  %v648_v4 = vadd.f32 %v640_v40, %v569_v37  ;;  %v652_v5 = vmul.f32 %v1665_v20, %v1653_v15  ;;  %v570_v59 = vadd.f32 %v562_v50, %v491_v58  ;;  %v731_v40 = vmul.f32 %v1668_v21, %v1671_v22 }
  0x90   : >> { %787 = vst [vmem:[%s1817_s3 + $0x20] sm:$0xff] %v726_v38  ;;  %v413_v56 = vadd.f32 %v405_v44, %v331_v0  ;;  %v495_v47 = vmul.f32 %v1688_v28, %v1638_v10  ;;  %v581_v61 = vadd.f32 %v573_v3, %v502_v60  ;;  %v343_v50 = vadd.f32 %v1632_v8, %v334_v36  ;;  %v2479_v36 = vld [vmem:[#allocation42_spill] sm:$0xff] }
  0x91   : >> { %v727_v18 = vadd.f32 %v719_v51, %v648_v4  ;;  %v649_v6 = vadd.f32 %v641_v13, %v570_v59  ;;  %v574_v44 = vmul.f32 %v1698_v33, %v1641_v11  ;;  %v653_v51 = vmul.f32 %v1701_v34, %v1653_v15 }
  0x92   : >> { %v492_v62 = vadd.f32 %v484_v12, %v413_v56  ;;  %v335_v12 = vmul.f32 %v1624_v7, %v1721_v41  ;;  %v417_v38 = vmul.f32 %v1724_v42, %v1635_v9  ;;  %v660_v13 = vadd.f32 %v652_v5, %v581_v61  ;;  %v2478_v5 = vld [vmem:[#allocation43_spill] sm:$0xff] }
  0x93   : >> { %788 = vst [vmem:[%s1817_s3 + $0x28] sm:$0xff] %v727_v18  ;;  %v728_v37 = vadd.f32 %v720_v45, %v649_v6  ;;  %v424_v0 = vadd.f32 %v416_v57, %v343_v50  ;;  %v732_v58 = vmul.f32 %v1704_v35, %v1671_v22  ;;  %v575_v3 = vmul.f32 %v1735_v48, %v1641_v11  ;;  %v2480_v18 = vld [vmem:[#allocation44_spill] sm:$0xff]  ;;  %v2482_v50 = vld [vmem:[#allocation46_spill] sm:$0xff] }
  0x94   : >> { %v571_v23 = vadd.f32 %v563_v30, %v492_v62  ;;  %v344_v55 = vadd.f32 %v1632_v8, %v335_v12  ;;  %v496_v30 = vmul.f32 %v1727_v43, %v1638_v10  ;;  %v739_v4 = vadd.f32 %v731_v40, %v660_v13  ;;  %v2481_v40 = vld [vmem:[#allocation45_spill] sm:$0xff]  ;;  %v2484_v13 = vld [vmem:[#allocation50_spill] sm:$0xff] }
  0x95   : >> { %789 = vst [vmem:[%s1817_s3 + $0x30] sm:$0xff] %v728_v37  ;;  %v503_v56 = vadd.f32 %v495_v47, %v424_v0  ;;  %v654_v45 = vmul.f32 %v1738_v49, %v1653_v15  ;;  %v336_v59 = vmul.f32 %v1624_v7, %v2478_v5  ;;  %v733_v57 = vmul.f32 %v2479_v36, %v1671_v22 }
  0x96   : >> { %v650_v52 = vadd.f32 %v642_v2, %v571_v23  ;;  %v425_v2 = vadd.f32 %v417_v38, %v344_v55  ;;  %v418_v62 = vmul.f32 %v2480_v18, %v1635_v9  ;;  %1110 = vst [vmem:[%s1817_s3 + $0x400] sm:$0xff] %v739_v4  ;;  %v497_v47 = vmul.f32 %v2481_v40, %v1638_v10  ;;  %v2485_v55 = vld [vmem:[#allocation48_spill] sm:$0xff] }
  0x97   : >> { %v582_v6 = vadd.f32 %v574_v44, %v503_v56  ;;  %v345_v61 = vadd.f32 %v1632_v8, %v336_v59  ;;  %v576_v23 = vmul.f32 %v2482_v50, %v1641_v11  ;;  %v337_v37 = vmul.f32 %v1624_v7, %v1782_v31  ;;  %v2486_v56 = vld [vmem:[#allocation51_spill] sm:$0xff]  ;;  %v2488_v31 = vld [vmem:[#allocation53_spill] sm:$0xff] }
  0x98   : >> { %v729_v60 = vadd.f32 %v721_v1, %v650_v52  ;;  %v504_v12 = vadd.f32 %v496_v30, %v425_v2  ;;  %v2483_v1 = vld [vmem:[#allocation47_spill] sm:$0xff]  ;;  %v419_v0 = vmul.f32 %v2484_v13, %v1635_v9  ;;  %v734_v4 = vmul.f32 %v2485_v55, %v1671_v22  ;;  %v2487_v2 = vld [vmem:[#allocation52_spill] sm:$0xff] }
  0x99   : >> { %v655_v38 = vmul.f32 %v2483_v1, %v1653_v15  ;;  %v661_v44 = vadd.f32 %v653_v51, %v582_v6  ;;  %v426_v52 = vadd.f32 %v418_v62, %v345_v61  ;;  %v498_v59 = vmul.f32 %v2486_v56, %v1638_v10 }
  0x9a   : >> { %790 = vst [vmem:[%s1817_s3 + $0x38] sm:$0xff] %v729_v60  ;;  %v583_v60 = vadd.f32 %v575_v3, %v504_v12  ;;  %v346_v30 = vadd.f32 %v1632_v8, %v337_v37  ;;  %v577_v1 = vmul.f32 %v2487_v2, %v1641_v11  ;;  %v656_v50 = vmul.f32 %v2488_v31, %v1653_v15  ;;  %v2489_v3 = vld [vmem:[#allocation54_spill] sm:$0xff]  ;;  %v2490_v37 = vld [vmem:[#allocation57_spill] sm:$0xff] }
  0x9b   : >> { %v740_v40 = vadd.f32 %v732_v58, %v661_v44  ;;  %v505_v13 = vadd.f32 %v497_v47, %v426_v52  ;;  %v338_v51 = vmul.f32 %v1624_v7, %v1809_v54  ;;  %v420_v62 = vmul.f32 %v1812_v63, %v1635_v9  ;;  %v2491_v47 = vld [vmem:[#allocation58_spill] sm:$0xff]  ;;  %v2492_v52 = vld [vmem:[#allocation59_spill] sm:$0xff] }
  0x9c   : >> { %v662_v6 = vadd.f32 %v654_v45, %v583_v60  ;;  %v427_v61 = vadd.f32 %v419_v0, %v346_v30  ;;  %v735_v12 = vmul.f32 %v2489_v3, %v1671_v22  ;;  %v499_v2 = vmul.f32 %v2490_v37, %v1638_v10  ;;  %v2493_v60 = vld [vmem:[#allocation60_spill] sm:$0xff] }
  0x9d   : >> { %1111 = vst [vmem:[%s1817_s3 + $0x408] sm:$0xff] %v740_v40  ;;  %v584_v56 = vadd.f32 %v576_v23, %v505_v13  ;;  %v347_v58 = vadd.f32 %v1632_v8, %v338_v51  ;;  %v578_v44 = vmul.f32 %v2491_v47, %v1641_v11  ;;  %v657_v54 = vmul.f32 %v2492_v52, %v1653_v15  ;;  %v2494_v40 = vld [vmem:[#allocation61_spill] sm:$0xff]  ;;  %v2495_v13 = vld [vmem:[#allocation62_spill] sm:$0xff] }
  0x9e   : >> { %v741_v63 = vadd.f32 %v733_v57, %v662_v6  ;;  %v506_v45 = vadd.f32 %v498_v59, %v427_v61  ;;  %v339_v0 = vmul.f32 %v1624_v7, %v1843_v39  ;;  %v421_v30 = vmul.f32 %v2493_v60, %v1635_v9  ;;  %v2496_v6 = vld [vmem:[#allocation63_spill] sm:$0xff] }
  0x9f   : >> { %v663_v3 = vadd.f32 %v655_v38, %v584_v56  ;;  %v428_v37 = vadd.f32 %v420_v62, %v347_v58  ;;  %v736_v23 = vmul.f32 %v2494_v40, %v1671_v22  ;;  %v500_v51 = vmul.f32 %v2495_v13, %v1638_v10 }
  0xa0   : >> { %1112 = vst [vmem:[%s1817_s3 + $0x410] sm:$0xff] %v741_v63  ;;  %v585_v47 = vadd.f32 %v577_v1, %v506_v45  ;;  %v348_v57 = vadd.f32 %v1632_v8, %v339_v0  ;;  %v579_v59 = vmul.f32 %v1864_v53, %v1641_v11  ;;  %v658_v61 = vmul.f32 %v2496_v6, %v1653_v15 }
  0xa1   : >> { %v742_v38 = vadd.f32 %v734_v4, %v663_v3  ;;  %v507_v56 = vadd.f32 %v499_v2, %v428_v37  ;;  %v340_v62 = vmul.f32 %v1624_v7, %v1875_v24  ;;  %v422_v58 = vmul.f32 %v1878_v46, %v1635_v9 }
  0xa2   : >> { %v664_v63 = vadd.f32 %v656_v50, %v585_v47  ;;  %v429_v1 = vadd.f32 %v421_v30, %v348_v57  ;;  %v737_v45 = vmul.f32 %v1885_v17, %v1671_v22  ;;  %v501_v0 = vmul.f32 %v1888_v29, %v1638_v10 }
  0xa3   : >> { %1113 = vst [vmem:[%s1817_s3 + $0x418] sm:$0xff] %v742_v38  ;;  %v586_v4 = vadd.f32 %v578_v44, %v507_v56  ;;  %v349_v2 = vadd.f32 %v1632_v8, %v340_v62  ;;  %v580_v7 = vmul.f32 %v1891_v16, %v1641_v11  ;;  %v659_v9 = vmul.f32 %v1900_v25, %v1653_v15  ;;  %v2497_v44 = vld [vmem:[#allocation34_spill] sm:$0xff]  ;;  %v2498_v15 = vld [vmem:[#allocation35_spill] sm:$0xff] }
  0xa4   : >> { %v743_v50 = vadd.f32 %v735_v12, %v664_v63  ;;  %v508_v3 = vadd.f32 %v500_v51, %v429_v1  ;;  %v2029_v37 = vstv %s1559_s30  ;;  %v2032_v47 = vstv %s1587_s26 }
  0xa5   : >> { %v665_v10 = vadd.f32 %v657_v54, %v586_v4  ;;  %v430_v30 = vadd.f32 %v422_v58, %v349_v2  ;;  %v351_v8 = vmul.f32 %v2029_v37, %v2497_v44  ;;  %v2037_v57 = vstv %s1561_s7 }
  0xa6   : >> { %1114 = vst [vmem:[%s1817_s3 + $0x420] sm:$0xff] %v743_v50  ;;  %v587_v11 = vadd.f32 %v579_v59, %v508_v3  ;;  %v432_v12 = vmul.f32 %v2498_v15, %v2037_v57  ;;  %v2043_v51 = vstv %s1563_s9  ;;  %v2046_v38 = vstv %s1565_s0 }
  0xa7   : >> { %v744_v56 = vadd.f32 %v736_v23, %v665_v10  ;;  %v509_v62 = vadd.f32 %v501_v0, %v430_v30  ;;  %v360_v54 = vadd.f32 %v2032_v47, %v351_v8  ;;  %v511_v58 = vmul.f32 %v1650_v14, %v2043_v51 }
  0xa8   : >> { %v666_v63 = vadd.f32 %v658_v61, %v587_v11  ;;  %v738_v1 = vmul.f32 %v1914_v32, %v1671_v22  ;;  %v2054_v59 = vstv %s1567_s2  ;;  %v2057_v4 = vstv %s1569_s20 }
  0xa9   : >> { %1115 = vst [vmem:[%s1817_s3 + $0x428] sm:$0xff] %v744_v56  ;;  %v588_v2 = vadd.f32 %v580_v7, %v509_v62  ;;  %v440_v50 = vadd.f32 %v432_v12, %v360_v54  ;;  %v590_v23 = vmul.f32 %v1662_v19, %v2046_v38  ;;  %v669_v0 = vmul.f32 %v1665_v20, %v2054_v59 }
  0xaa   : >> { %v745_v3 = vadd.f32 %v737_v45, %v666_v63  ;;  %v748_v61 = vmul.f32 %v1668_v21, %v2057_v4  ;;  %v352_v22 = vmul.f32 %v2029_v37, %v1682_v26  ;;  %v433_v10 = vmul.f32 %v1685_v27, %v2037_v57 }
  0xab   : >> { %v667_v30 = vadd.f32 %v659_v9, %v588_v2  ;;  %v519_v8 = vadd.f32 %v511_v58, %v440_v50  ;;  %v512_v7 = vmul.f32 %v1688_v28, %v2043_v51  ;;  %v591_v11 = vmul.f32 %v1698_v33, %v2046_v38 }
  0xac   : >> { %1116 = vst [vmem:[%s1817_s3 + $0x430] sm:$0xff] %v745_v3  ;;  %v361_v45 = vadd.f32 %v2032_v47, %v352_v22  ;;  %v670_v12 = vmul.f32 %v1701_v34, %v2054_v59  ;;  %v353_v56 = vmul.f32 %v2029_v37, %v1721_v41  ;;  %v434_v9 = vmul.f32 %v1724_v42, %v2037_v57 }
  0xad   : >> { %v746_v62 = vadd.f32 %v738_v1, %v667_v30  ;;  %v598_v54 = vadd.f32 %v590_v23, %v519_v8  ;;  %v749_v58 = vmul.f32 %v1704_v35, %v2057_v4  ;;  %v513_v63 = vmul.f32 %v1727_v43, %v2043_v51  ;;  %v2502_v43 = vld [vmem:[#allocation49_spill] sm:$0xff] }
  0xae   : >> { %v441_v2 = vadd.f32 %v433_v10, %v361_v45  ;;  %v362_v50 = vadd.f32 %v2032_v47, %v353_v56  ;;  %v592_v3 = vmul.f32 %v1735_v48, %v2046_v38  ;;  %v671_v22 = vmul.f32 %v1738_v49, %v2054_v59  ;;  %v2499_v45 = vld [vmem:[#allocation45_spill] sm:$0xff]  ;;  %v2500_v48 = vld [vmem:[#allocation46_spill] sm:$0xff] }
  0xaf   : >> { %1117 = vst [vmem:[%s1817_s3 + $0x438] sm:$0xff] %v746_v62  ;;  %v677_v34 = vadd.f32 %v669_v0, %v598_v54  ;;  %v750_v1 = vmul.f32 %v2479_v36, %v2057_v4  ;;  %v354_v23 = vmul.f32 %v2029_v37, %v2478_v5  ;;  %v435_v10 = vmul.f32 %v2480_v18, %v2037_v57  ;;  %v2501_v54 = vld [vmem:[#allocation47_spill] sm:$0xff] }
  0xb0   : >> { %v520_v30 = vadd.f32 %v512_v7, %v441_v2  ;;  %v442_v8 = vadd.f32 %v434_v9, %v362_v50  ;;  %v514_v56 = vmul.f32 %v2499_v45, %v2043_v51  ;;  %v593_v49 = vmul.f32 %v2500_v48, %v2046_v38  ;;  %v2503_v9 = vld [vmem:[#allocation50_spill] sm:$0xff] }
  0xb1   : >> { %v756_v62 = vadd.f32 %v748_v61, %v677_v34  ;;  %v363_v0 = vadd.f32 %v2032_v47, %v354_v23  ;;  %v672_v36 = vmul.f32 %v2501_v54, %v2054_v59  ;;  %v355_v5 = vmul.f32 %v2029_v37, %v2502_v43  ;;  %v2504_v61 = vld [vmem:[#allocation51_spill] sm:$0xff]  ;;  %v2505_v54 = vld [vmem:[#allocation52_spill] sm:$0xff] }
  0xb2   : >> { %v599_v35 = vadd.f32 %v591_v11, %v520_v30  ;;  %v521_v42 = vadd.f32 %v513_v63, %v442_v8  ;;  %v751_v7 = vmul.f32 %v2485_v55, %v2057_v4  ;;  %v436_v2 = vmul.f32 %v2503_v9, %v2037_v57  ;;  %v2506_v30 = vld [vmem:[#allocation55_spill] sm:$0xff] }
  0xb3   : >> { %1120 = vst [vmem:[%s1817_s3 + $0x800] sm:$0xff] %v756_v62  ;;  %v443_v50 = vadd.f32 %v435_v10, %v363_v0  ;;  %v364_v34 = vadd.f32 %v2032_v47, %v355_v5  ;;  %v515_v23 = vmul.f32 %v2504_v61, %v2043_v51  ;;  %v594_v48 = vmul.f32 %v2505_v54, %v2046_v38  ;;  %v2507_v10 = vld [vmem:[#allocation54_spill] sm:$0xff]  ;;  %v2508_v0 = vld [vmem:[#allocation56_spill] sm:$0xff] }
  0xb4   : >> { %v678_v45 = vadd.f32 %v670_v12, %v599_v35  ;;  %v600_v11 = vadd.f32 %v592_v3, %v521_v42  ;;  %v673_v63 = vmul.f32 %v2488_v31, %v2054_v59  ;;  %v356_v8 = vmul.f32 %v2029_v37, %v2506_v30  ;;  %v2509_v42 = vld [vmem:[#allocation57_spill] sm:$0xff]  ;;  %v2510_v54 = vld [vmem:[#allocation58_spill] sm:$0xff] }
  0xb5   : >> { %v522_v55 = vadd.f32 %v514_v56, %v443_v50  ;;  %v444_v62 = vadd.f32 %v436_v2, %v364_v34  ;;  %v752_v5 = vmul.f32 %v2507_v10, %v2057_v4  ;;  %v437_v61 = vmul.f32 %v2508_v0, %v2037_v57 }
  0xb6   : >> { %v757_v9 = vadd.f32 %v749_v58, %v678_v45  ;;  %v679_v43 = vadd.f32 %v671_v22, %v600_v11  ;;  %v365_v35 = vadd.f32 %v2032_v47, %v356_v8  ;;  %v516_v12 = vmul.f32 %v2509_v42, %v2043_v51 }
  0xb7   : >> { %v601_v3 = vadd.f32 %v593_v49, %v522_v55  ;;  %v523_v31 = vadd.f32 %v515_v23, %v444_v62  ;;  %v595_v56 = vmul.f32 %v2510_v54, %v2046_v38  ;;  %v674_v2 = vmul.f32 %v2492_v52, %v2054_v59 }
  0xb8   : >> { %1121 = vst [vmem:[%s1817_s3 + $0x808] sm:$0xff] %v757_v9  ;;  %v758_v50 = vadd.f32 %v750_v1, %v679_v43  ;;  %v445_v34 = vadd.f32 %v437_v61, %v365_v35  ;;  %v357_v58 = vmul.f32 %v2029_v37, %v1843_v39  ;;  %v438_v22 = vmul.f32 %v2493_v60, %v2037_v57 }
  0xb9   : >> { %v680_v45 = vadd.f32 %v672_v36, %v601_v3  ;;  %v602_v11 = vadd.f32 %v594_v48, %v523_v31  ;;  %v753_v49 = vmul.f32 %v2494_v40, %v2057_v4  ;;  %v517_v55 = vmul.f32 %v2495_v13, %v2043_v51 }
  0xba   : >> { %1122 = vst [vmem:[%s1817_s3 + $0x810] sm:$0xff] %v758_v50  ;;  %v524_v23 = vadd.f32 %v516_v12, %v445_v34  ;;  %v366_v43 = vadd.f32 %v2032_v47, %v357_v58  ;;  %v596_v1 = vmul.f32 %v1864_v53, %v2046_v38  ;;  %v675_v9 = vmul.f32 %v2496_v6, %v2054_v59 }
  0xbb   : >> { %v759_v36 = vadd.f32 %v751_v7, %v680_v45  ;;  %v681_v48 = vadd.f32 %v673_v63, %v602_v11  ;;  %v358_v31 = vmul.f32 %v2029_v37, %v1875_v24  ;;  %v439_v61 = vmul.f32 %v1878_v46, %v2037_v57 }
  0xbc   : >> { %v603_v8 = vadd.f32 %v595_v56, %v524_v23  ;;  %v446_v62 = vadd.f32 %v438_v22, %v366_v43  ;;  %v754_v35 = vmul.f32 %v1885_v17, %v2057_v4  ;;  %v518_v12 = vmul.f32 %v1888_v29, %v2043_v51 }
  0xbd   : >> { %1123 = vst [vmem:[%s1817_s3 + $0x818] sm:$0xff] %v759_v36  ;;  %v760_v7 = vadd.f32 %v752_v5, %v681_v48  ;;  %v367_v63 = vadd.f32 %v2032_v47, %v358_v31  ;;  %v597_v37 = vmul.f32 %v1891_v16, %v2046_v38  ;;  %v676_v57 = vmul.f32 %v1900_v25, %v2054_v59 }
  0xbe   : >> { %v682_v3 = vadd.f32 %v674_v2, %v603_v8  ;;  %v525_v56 = vadd.f32 %v517_v55, %v446_v62  ;;  %v2162_v50 = vstv %s2511_s17  ;;  %v2165_v34 = vstv %s1589_s15  ;;  %s2531_s17 = sld [smem:[#allocation29_spill]] (%p296_p4) }
  0xbf   : >> { %1124 = vst [vmem:[%s1817_s3 + $0x820] sm:$0xff] %v760_v7  ;;  %v447_v51 = vadd.f32 %v439_v61, %v367_v63  ;;  %v369_v47 = vmul.f32 %v2162_v50, %v2497_v44  ;;  %v2171_v5 = vstv %s1573_s27  ;;  %v2174_v38 = vstv %s1575_s14 }
  0xc0   : >> { %v761_v59 = vadd.f32 %v753_v49, %v682_v3  ;;  %v604_v58 = vadd.f32 %v596_v1, %v525_v56  ;;  %v449_v2 = vmul.f32 %v2498_v15, %v2171_v5  ;;  %v528_v22 = vmul.f32 %v1650_v14, %v2174_v38  ;;  %v2517_v56 = vld [vmem:[#allocation39_spill] sm:$0xff] }
  0xc1   : >> { %v526_v45 = vadd.f32 %v518_v12, %v447_v51  ;;  %v378_v11 = vadd.f32 %v2165_v34, %v369_v47  ;;  %v2182_v55 = vstv %s1577_s13  ;;  %v2185_v23 = vstv %s2512_s28  ;;  %v2518_v51 = vld [vmem:[#allocation43_spill] sm:$0xff] }
  0xc2   : >> { %1125 = vst [vmem:[%s1817_s3 + $0x828] sm:$0xff] %v761_v59  ;;  %v683_v44 = vadd.f32 %v675_v9, %v604_v58  ;;  %v755_v49 = vmul.f32 %v1914_v32, %v2057_v4  ;;  %v607_v43 = vmul.f32 %v1662_v19, %v2182_v55  ;;  %v2193_v36 = vstv %s2513_s1  ;;  %v2519_v58 = vld [vmem:[#allocation40_spill] sm:$0xff] }
  0xc3   : >> { %v605_v15 = vadd.f32 %v597_v37, %v526_v45  ;;  %v457_v1 = vadd.f32 %v449_v2, %v378_v11  ;;  %v370_v14 = vmul.f32 %v2162_v50, %v1682_v26  ;;  %v686_v31 = vmul.f32 %v1665_v20, %v2185_v23  ;;  %v2515_v37 = vld [vmem:[#allocation36_spill] sm:$0xff]  ;;  %v2520_v11 = vld [vmem:[#allocation41_spill] sm:$0xff] }
  0xc4   : >> { %v762_v48 = vadd.f32 %v754_v35, %v683_v44  ;;  %v450_v9 = vmul.f32 %v1685_v27, %v2171_v5  ;;  %v529_v19 = vmul.f32 %v1688_v28, %v2174_v38  ;;  %v765_v62 = vmul.f32 %v1668_v21, %v2193_v36  ;;  %v2514_v27 = vld [vmem:[#allocation38_spill] sm:$0xff]  ;;  %v2516_v28 = vld [vmem:[#allocation37_spill] sm:$0xff]  ;;  %s822_s28 = scalar_lea.sflag (%p296_p4), [#allocation4], %s2531_s17 }
  0xc5   : >> { %v684_v61 = vadd.f32 %v676_v57, %v605_v15  ;;  %v536_v8 = vadd.f32 %v528_v22, %v457_v1  ;;  %v379_v4 = vadd.f32 %v2165_v34, %v370_v14  ;;  %v608_v26 = vmul.f32 %v1698_v33, %v2182_v55 }
  0xc6   : >> { %1126 = vst [vmem:[%s1817_s3 + $0x830] sm:$0xff] %v762_v48  ;;  %v371_v20 = vmul.f32 %v2162_v50, %v1721_v41  ;;  %v451_v35 = vmul.f32 %v2514_v27, %v2171_v5  ;;  %v687_v57 = vmul.f32 %v2515_v37, %v2185_v23  ;;  %v766_v3 = vmul.f32 %v2516_v28, %v2193_v36  ;;  %v2522_v48 = vld [vmem:[#allocation42_spill] sm:$0xff] }
  0xc7   : >> { %v763_v12 = vadd.f32 %v755_v49, %v684_v61  ;;  %v615_v7 = vadd.f32 %v607_v43, %v536_v8  ;;  %v458_v63 = vadd.f32 %v450_v9, %v379_v4  ;;  %v530_v33 = vmul.f32 %v2517_v56, %v2174_v38  ;;  %v2521_v43 = vld [vmem:[#allocation45_spill] sm:$0xff] }
  0xc8   : >> { %v380_v21 = vadd.f32 %v2165_v34, %v371_v20  ;;  %v372_v41 = vmul.f32 %v2162_v50, %v2518_v51  ;;  %v609_v2 = vmul.f32 %v2519_v58, %v2182_v55  ;;  %v452_v22 = vmul.f32 %v2480_v18, %v2171_v5  ;;  %v2523_v9 = vld [vmem:[#allocation49_spill] sm:$0xff]  ;;  %v2524_v18 = vld [vmem:[#allocation46_spill] sm:$0xff] }
  0xc9   : >> { %1127 = vst [vmem:[%s1817_s3 + $0x838] sm:$0xff] %v763_v12  ;;  %v694_v47 = vadd.f32 %v686_v31, %v615_v7  ;;  %v537_v59 = vadd.f32 %v529_v19, %v458_v63  ;;  %v688_v44 = vmul.f32 %v2520_v11, %v2185_v23  ;;  %v531_v15 = vmul.f32 %v2521_v43, %v2174_v38  ;;  %v2525_v20 = vld [vmem:[#allocation50_spill] sm:$0xff]  ;;  %v2526_v12 = vld [vmem:[#allocation47_spill] sm:$0xff] }
  0xca   : >> { %v459_v45 = vadd.f32 %v451_v35, %v380_v21  ;;  %v381_v49 = vadd.f32 %v2165_v34, %v372_v41  ;;  %v767_v31 = vmul.f32 %v2522_v48, %v2193_v36  ;;  %v373_v61 = vmul.f32 %v2162_v50, %v2523_v9  ;;  %v2527_v7 = vld [vmem:[#allocation51_spill] sm:$0xff]  ;;  %v2528_v21 = vld [vmem:[#allocation48_spill] sm:$0xff] }
  0xcb   : >> { %v773_v1 = vadd.f32 %v765_v62, %v694_v47  ;;  %v616_v14 = vadd.f32 %v608_v26, %v537_v59  ;;  %v610_v19 = vmul.f32 %v2524_v18, %v2182_v55  ;;  %v453_v27 = vmul.f32 %v2525_v20, %v2171_v5 }
  0xcc   : >> { %v538_v8 = vadd.f32 %v530_v33, %v459_v45  ;;  %v460_v4 = vadd.f32 %v452_v22, %v381_v49  ;;  %v689_v62 = vmul.f32 %v2526_v12, %v2185_v23  ;;  %v382_v26 = vadd.f32 %v2165_v34, %v373_v61 }
  0xcd   : >> { %1130 = vst [vmem:[%s1817_s3 + $0xc00] sm:$0xff] %v773_v1  ;;  %v695_v35 = vadd.f32 %v687_v57, %v616_v14  ;;  %v532_v63 = vmul.f32 %v2527_v7, %v2174_v38  ;;  %v768_v56 = vmul.f32 %v2528_v21, %v2193_v36  ;;  %v374_v33 = vmul.f32 %v2162_v50, %v2506_v30  ;;  %v2529_v57 = vld [vmem:[#allocation52_spill] sm:$0xff]  ;;  %v2530_v30 = vld [vmem:[#allocation53_spill] sm:$0xff] }
  0xce   : >> { %v617_v37 = vadd.f32 %v609_v2, %v538_v8  ;;  %v539_v28 = vadd.f32 %v531_v15, %v460_v4  ;;  %v461_v41 = vadd.f32 %v453_v27, %v382_v26  ;;  %v611_v47 = vmul.f32 %v2529_v57, %v2182_v55 }
  0xcf   : >> { %v774_v51 = vadd.f32 %v766_v3, %v695_v35  ;;  %v454_v59 = vmul.f32 %v2508_v0, %v2171_v5  ;;  %v383_v2 = vadd.f32 %v2165_v34, %v374_v33  ;;  %v533_v45 = vmul.f32 %v2509_v42, %v2174_v38 }
  0xd0   : >> { %v696_v58 = vadd.f32 %v688_v44, %v617_v37  ;;  %v618_v22 = vadd.f32 %v610_v19, %v539_v28  ;;  %v540_v11 = vadd.f32 %v532_v63, %v461_v41  ;;  %v690_v3 = vmul.f32 %v2530_v30, %v2185_v23 }
  0xd1   : >> { %1131 = vst [vmem:[%s1817_s3 + $0xc08] sm:$0xff] %v774_v51  ;;  %v612_v49 = vmul.f32 %v2510_v54, %v2182_v55  ;;  %v375_v43 = vmul.f32 %v2162_v50, %v1843_v39  ;;  %v462_v15 = vadd.f32 %v454_v59, %v383_v2  ;;  %v455_v1 = vmul.f32 %v2493_v60, %v2171_v5 }
  0xd2   : >> { %v775_v0 = vadd.f32 %v767_v31, %v696_v58  ;;  %v697_v44 = vadd.f32 %v689_v62, %v618_v22  ;;  %v619_v14 = vadd.f32 %v611_v47, %v540_v11  ;;  %v769_v42 = vmul.f32 %v2507_v10, %v2193_v36 }
  0xd3   : >> { %v384_v48 = vadd.f32 %v2165_v34, %v375_v43  ;;  %v534_v9 = vmul.f32 %v2495_v13, %v2174_v38  ;;  %v541_v61 = vadd.f32 %v533_v45, %v462_v15  ;;  %v691_v39 = vmul.f32 %v2492_v52, %v2185_v23 }
  0xd4   : >> { %1132 = vst [vmem:[%s1817_s3 + $0xc10] sm:$0xff] %v775_v0  ;;  %v776_v54 = vadd.f32 %v768_v56, %v697_v44  ;;  %v613_v31 = vmul.f32 %v1864_v53, %v2182_v55  ;;  %v698_v60 = vadd.f32 %v690_v3, %v619_v14  ;;  %v376_v10 = vmul.f32 %v2162_v50, %v1875_v24 }
  0xd5   : >> { %v463_v8 = vadd.f32 %v455_v1, %v384_v48  ;;  %v456_v4 = vmul.f32 %v1878_v46, %v2171_v5  ;;  %v620_v13 = vadd.f32 %v612_v49, %v541_v61  ;;  %v770_v18 = vmul.f32 %v2494_v40, %v2193_v36 }
  0xd6   : >> { %1133 = vst [vmem:[%s1817_s3 + $0xc18] sm:$0xff] %v776_v54  ;;  %v692_v52 = vmul.f32 %v2496_v6, %v2185_v23  ;;  %v777_v19 = vadd.f32 %v769_v42, %v698_v60  ;;  %v385_v53 = vadd.f32 %v2165_v34, %v376_v10  ;;  %v535_v24 = vmul.f32 %v1888_v29, %v2174_v38 }
  0xd7   : >> { %v542_v20 = vadd.f32 %v534_v9, %v463_v8  ;;  %v699_v50 = vadd.f32 %v691_v39, %v620_v13  ;;  %v771_v5 = vmul.f32 %v1885_v17, %v2193_v36  ;;  %v614_v27 = vmul.f32 %v1891_v16, %v2182_v55 }
  0xd8   : >> { %1134 = vst [vmem:[%s1817_s3 + $0xc20] sm:$0xff] %v777_v19  ;;  %v464_v40 = vadd.f32 %v456_v4, %v385_v53  ;;  %v693_v34 = vmul.f32 %v1900_v25, %v2185_v23  ;;  %v772_v38 = vmul.f32 %v1914_v32, %v2193_v36 }
  0xd9   : >> { %v621_v46 = vadd.f32 %v613_v31, %v542_v20  ;;  %v778_v6 = vadd.f32 %v770_v18, %v699_v50 }
  0xda   : >> { %v543_v12 = vadd.f32 %v535_v24, %v464_v40 }
  0xdb   : >> { %v700_v35 = vadd.f32 %v692_v52, %v621_v46  ;;  %1135 = vst [vmem:[%s1817_s3 + $0xc28] sm:$0xff] %v778_v6 }
  0xdc   : >> { %v622_v29 = vadd.f32 %v614_v27, %v543_v12 }
  0xdd   : >> { %v779_v62 = vadd.f32 %v771_v5, %v700_v35 }
  0xde   : >> { %v701_v26 = vadd.f32 %v693_v34, %v622_v29  ;;  %298 = sbr.rel (!%p296_p4) target bundleno = 105 (0x69), region = 113 }
  0xdf   : >> { %1136 = vst [vmem:[%s1817_s3 + $0xc30] sm:$0xff] %v779_v62 }
  0xe0   : >> { %v780_v7 = vadd.f32 %v772_v38, %v701_v26 }
  0xe2   : >> { %1137 = vst [vmem:[%s1817_s3 + $0xc38] sm:$0xff] %v780_v7 }
  0xe3   : > { %s2532_s1 = sld [smem:[#allocation22_spill]]  ;;  %s847_s0 = sshll.u32 %s1591_s5, 4  ;;  %s848_s0 = int_to_ptr.vmem [resolvable:$true] %s847_s0 }
  0xe4   : > { %s2534_s6 = sld [smem:[#allocation67_spill]]  ;;  %s1379_s12 = smov 16384  }
  0xe5   : > { %1177 = sst [smem:[#allocation13]] (%p1462_p9), %s1379_s12  ;;  %s1380_s13 = smov 32768  }
  0xe6   : > { %1178 = sst [smem:[#allocation13 + $0x1]] (%p1462_p9), %s1380_s13  ;;  %s1381_s14 = smov 32  }
  0xe7   : > { %1179 = sst [smem:[#allocation13 + $0x2]] (%p1462_p9), %s1381_s14  ;;  %s1382_s15 = smov 512  }
  0xe8   : > { %1180 = sst [smem:[#allocation13 + $0x3]] (%p1462_p9), %s1382_s15  ;;  %s1383_s20 = smov [#allocation12]  }
  0xe9   : > { %s1157_s16 = sshll.u32 %s2532_s1, 10  ;;  %1181 = sst [smem:[#allocation13 + $0x4]] (%p1462_p9), %s1382_s15 }
  0xea   : > { %s836_s7 = scalar_lea.hbm %s2534_s6, %s1157_s16  ;;  %1182 = sst [smem:[#allocation13 + $0x5]] (%p1462_p9), %s1381_s14 }
  0xeb   : > { %s849_s8 = sshll.u32 %s836_s7, 4  ;;  %s1384_s26 = smov 0   ;;  %s850_s8 = int_to_ptr.hbm [resolvable:$true] %s849_s8 }
  0xec   : > { %1183 = dma.general (%p1462_p9), %s848_s0, 65536, %s850_s8, %s822_s28, %s1383_s20, [#allocation13], %s1384_s26, 0  }
  0xed PF: > { %s2535_s27 = sld [smem:[#allocation19_spill]]  ;;  %p1193_p5 = pnand %p1018_p3, %p1469_p11 }
  0xee   : > { %s2537_s22 = sld [smem:[#allocation24_spill]] }
  0xef   : > { %p1194_p6 = pneg %p1193_p5 }
  0xf3   : > { %s877_s29 = sand.u32 1, %s2535_s27  }
  0xf4   : > { %s878_s25 = scalar_lea.sflag [#allocation4], %s877_s29 }
  0xf5   : > { %1341 = dma.done.wait (%p1194_p6), %s878_s25, 65536  }
  0xf6   : > { %1343 = vsyncadd (%p1194_p6), %s878_s25, 4294901760  ;;  %s21_s17 = sadd.s32 1, %s2537_s22   ;;  %s2538_s12 = sld [smem:[#allocation20_spill]] }
  0xf7   : > { %p18_p7 = scmp.ge.s32.totalorder %s21_s17, 4   ;;  %s2539_s13 = sld [smem:[#allocation21_spill]] }
  0xf8   : > { %s2540_s14 = sld [smem:[#allocation27_spill]] }
  0xf9   : > { %s2541_s15 = sld [smem:[#allocation23_spill]]  ;;  %20 = sbr.rel (!%p18_p7) target bundleno = 13 (0xd), region = 124 }
  0xfa   : > { %s2542_s16 = sld [smem:[#allocation25_spill]] }
  0xfe   :  { %884 = vsyncpa [#allocation3], 1 }
  0xff   :  { %886 = vsyncpa [#allocation3 + $0x1], 1 }
 0x100   :  { %887 = vsyncpa [#allocation4], 1 }
 0x101   :  { %889 = vsyncpa [#allocation4 + $0x1], 1 }
 0x102   :  { %890 = vsyncpa [#allocation5], 1 }
 0x103   :  { %892 = vsyncpa [#allocation5 + $0x1], 1 }
 0x104   :  { %893 = vsyncpa [#allocation8], 1 }

</bundles_post_ra>
